<compile_context>
chip_gen: v7x
topology: tpu7x:2x2x1
jax: 0.10.0
libtpu: 0.0.40
codegen_flags: <defaults>
</compile_context>

<pallas_src>
import math

import numpy as np
import jax
import jax.numpy as jnp
from jax.experimental import pallas as pl
from jax.experimental.pallas import tpu as pltpu

# ---------------------------------------------------------------------------
# db1 (Haar) analysis filters (pywt dec_lo / dec_hi), flipped as in
# lowlevel.prep_filt_afb2d (PyTorch conv2d is cross-correlation).
# ---------------------------------------------------------------------------
_SQRT2_INV = np.float32(1.0 / np.sqrt(2.0))
DEC_LO = np.array([_SQRT2_INV, _SQRT2_INV], dtype=np.float32)    # pywt db1 dec_lo
DEC_HI = np.array([-_SQRT2_INV, _SQRT2_INV], dtype=np.float32)   # pywt db1 dec_hi
H0 = DEC_LO[::-1].copy()   # flipped -> cross-correlation weights
H1 = DEC_HI[::-1].copy()
# TODO(synk): only 'db1' + mode='zero' filters are built in-script (no pywt);
# other wavelets / padding modes need their own analysis-matrix builders.


def _analysis_matrix(n, filt):
    """Stride-2, zero-padded analysis matrix A (outsize, n): out = A @ signal.

    Reproduces lowlevel.afb1d with mode='zero' (pad from pywt.dwt_coeff_len).
    """
    L = len(filt)
    outsize = (n + L - 1) // 2
    p = 2 * outsize - n - L + 2
    pad_front = p // 2
    A = np.zeros((outsize, n), dtype=np.float32)
    for i in range(outsize):
        for k in range(L):
            idx = 2 * i + k - pad_front
            if 0 <= idx < n:
                A[i, idx] = filt[k]
    return A


def _build_wcat(W, Wo, Wo_pad, dtype):
    """Fused [row-lo | row-hi] analysis matrix (W, 2*Wo_pad).

    The column-pass 1/sqrt(2) is folded in, so every non-zero entry is exactly
    +/-0.5 (exactly representable in bf16).  The lo half lives in columns
    [0, Wo), the hi half starts at the lane-tile-aligned column Wo_pad.
    """
    aw_lo = _analysis_matrix(W, H0)            # (Wo, W)
    aw_hi = _analysis_matrix(W, H1)            # (Wo, W)
    wcat = np.zeros((W, 2 * Wo_pad), dtype=np.float32)
    wcat[:, :Wo] = aw_lo.T * _SQRT2_INV
    wcat[:, Wo_pad:Wo_pad + Wo] = aw_hi.T * _SQRT2_INV
    return jnp.asarray(wcat, dtype=dtype)


# ---------------------------------------------------------------------------
# Pallas kernel: B image planes per grid step.
#   x_ref   : (B*H, W)         flattened stack of B image planes
#   wcat_ref: (W, 2*Wo_pad)    fused [row-lo | row-hi] analysis matrix (* 1/sqrt(2))
#   ll_ref  : (B*Ho, Wo)       LL subband (row-major == final (N,C,Ho,Wo) layout)
#   yh_ref  : (B, 3, Ho, Wo)   (LH, HL, HH) subbands
# ---------------------------------------------------------------------------
def _dwt_kernel(x_ref, wcat_ref, ll_ref, yh_ref):
    B, _, Ho, Wo = yh_ref.shape
    M = B * Ho
    Wo_pad = wcat_ref.shape[1] // 2
    mdt = wcat_ref.dtype

    w = wcat_ref[...]

    # Even / odd image rows straight off the pipelined block (sublane-strided
    # vld), fed to the MXU in the filter dtype — no concat / pre-matmul copy.
    xe = x_ref[pl.ds(0, M, stride=2), :].astype(mdt)    # (M, W)
    xo = x_ref[pl.ds(1, M, stride=2), :].astype(mdt)    # (M, W)

    # Row (width) analysis on the MXU with fused lo|hi filters, f32 accumulate.
    ye = jnp.dot(xe, w, preferred_element_type=jnp.float32)   # (M, 2*Wo_pad)
    yo = jnp.dot(xo, w, preferred_element_type=jnp.float32)   # (M, 2*Wo_pad)

    # Lane-aligned views of the lo / hi halves (Wo_pad % 128 == 0 when Wo > 128).
    ye_lo, ye_hi = ye[:, :Wo], ye[:, Wo_pad:Wo_pad + Wo]
    yo_lo, yo_hi = yo[:, :Wo], yo[:, Wo_pad:Wo_pad + Wo]

    # Column (height) analysis on the VPU (Haar = pairwise sum / diff of the
    # even/odd-row results) + four direct subband stores, final PyTorch layout.
    odt = ll_ref.dtype
    ll_ref[...] = (ye_lo + yo_lo).astype(odt)                                # LL
    yh_ref[:, 0, :, :] = (ye_lo - yo_lo).reshape(B, Ho, Wo).astype(odt)      # LH
    yh_ref[:, 1, :, :] = (ye_hi + yo_hi).reshape(B, Ho, Wo).astype(odt)      # HL
    yh_ref[:, 2, :, :] = (ye_hi - yo_hi).reshape(B, Ho, Wo).astype(odt)      # HH


# ---------------------------------------------------------------------------
# Generation-aware tiling heuristics.
# ---------------------------------------------------------------------------
def _hw_params():
    """Per-generation knobs: TensorCore count and VMEM budget."""
    kind = ""
    try:
        kind = jax.devices()[0].device_kind.lower()
    except Exception:
        pass
    if "v7" in kind:
        # v7x: 2 TensorCores / chip, 64 MiB physical VMEM (32 MiB scoped default).
        return {"two_cores": True,
                "block_bytes": 3 * 1024 * 1024 + 512 * 1024,
                "vmem_limit": 44 * 1024 * 1024}
    if "v5 lite" in kind or "v5e" in kind or "v6" in kind:
        # v5e / v6e: single TensorCore, 128 MiB physical VMEM -> big blocks.
        return {"two_cores": False,
                "block_bytes": 8 * 1024 * 1024,
                "vmem_limit": 64 * 1024 * 1024}
    # Unknown / other (v4, v5p, ...): assume megacore + conservative VMEM.
    return {"two_cores": True,
            "block_bytes": 4 * 1024 * 1024,
            "vmem_limit": 32 * 1024 * 1024}


def _choose_block(nc, h, ho, w, itemsize, target_bytes, two_cores):
    """Planes per grid step.

    (B*Ho) % 8 == 0 keeps the flattened input/LL blocks sublane-aligned
    (it implies (B*H) % 8 == 0 since H = 2*Ho); a full-array block is always
    layout-legal.  On dual-TensorCore chips the block is capped so the
    'parallel' grid has >= 2 steps and both cores get work; on single-core
    chips we just take the biggest block that fits the byte target (fewer,
    fatter steps -> less per-step pipeline overhead).
    """
    plane_bytes = max(1, h * w * itemsize)
    step = 8 // math.gcd(ho, 8)
    b = max(1, int(target_bytes) // plane_bytes)
    if two_cores and nc >= 2 * step:
        b = min(b, nc // 2)
    b = max(step, (b // step) * step)
    if b >= nc:
        return nc
    return b


def _dwt_level(x, mxu_dtype):
    """One level of 2-D db1 DWT (zero padding). x: (N, C, H, W) -> (ll, yh)."""
    N, C, H, W = x.shape
    assert H % 2 == 0, "db1 VPU column pass requires even H"
    # TODO(synk): odd H (zero-mode boundary row) needs a dedicated tail path.
    NC = N * C
    Ho = H // 2
    Wo = (W + 1) // 2
    # Lane-tile-align the lo|hi halves of the fused filter so the in-kernel
    # slices of the matmul output are free views.  For Wo <= 128 padding would
    # only bloat the matmul; TODO(synk): lane-dense fused [ll|lh|hl|hh] output
    # slab for the Wo < 128 (masked-store) regime.
    Wo_pad = Wo if Wo <= 128 else ((Wo + 127) // 128) * 128

    hw = _hw_params()
    itemsize = np.dtype(x.dtype).itemsize
    wcat_bytes = W * 2 * Wo_pad * np.dtype(mxu_dtype).itemsize
    # Per-step VMEM ~= 2*in (dbuf) + 2*out (dbuf) + ~2*in of f32 temps + 2*wcat.
    budget = (int(0.85 * hw["vmem_limit"]) - 2 * wcat_bytes) // 7
    target = max(min(hw["block_bytes"], budget), H * W * itemsize)
    B = _choose_block(NC, H, Ho, W, itemsize, target, hw["two_cores"])
    grid = (pl.cdiv(NC, B),)   # ragged last block is handled by Pallas

    wcat = _build_wcat(W, Wo, Wo_pad, mxu_dtype)
    x2 = x.reshape(NC * H, W)

    flops = int(8 * NC * Ho * W * Wo_pad        # two fused row-pass matmuls
                + 4 * NC * Ho * Wo)             # VPU column-pass adds/subs
    bytes_accessed = int((NC * H * W + 4 * NC * Ho * Wo) * itemsize + 2 * wcat_bytes)

    ll2d, yh = pl.pallas_call(
        _dwt_kernel,
        out_shape=(
            jax.ShapeDtypeStruct((NC * Ho, Wo), x.dtype),
            jax.ShapeDtypeStruct((NC, 3, Ho, Wo), x.dtype),
        ),
        grid_spec=pltpu.PrefetchScalarGridSpec(
            num_scalar_prefetch=0,
            grid=grid,
            in_specs=[
                pl.BlockSpec((B * H, W), lambda i: (i, 0)),
                pl.BlockSpec((W, 2 * Wo_pad), lambda i: (0, 0)),
            ],
            out_specs=[
                pl.BlockSpec((B * Ho, Wo), lambda i: (i, 0)),
                pl.BlockSpec((B, 3, Ho, Wo), lambda i: (i, 0, 0, 0)),
            ],
        ),
        compiler_params=pltpu.CompilerParams(
            dimension_semantics=("parallel",),
            vmem_limit_bytes=hw["vmem_limit"],
        ),
        cost_estimate=pl.CostEstimate(
            flops=flops, transcendentals=0, bytes_accessed=bytes_accessed),
    )(x2, wcat)

    # Both reshapes are contiguity-preserving (metadata only, no copies).
    return ll2d.reshape(N, C, Ho, Wo), yh.reshape(N, C, 3, Ho, Wo)


def dwt_forward(x, J=1, use_bf16_mxu=None):
    """Equivalent of DWTForward(J=J, wave='db1', mode='zero').forward(x).

    use_bf16_mxu: None -> bf16 MXU path iff the input is bfloat16 (keeps the
    exact f32 path for f32 inputs); True/False to force.  The filter matrix is
    exact (+/-0.5) in bf16, so only LHS rounding is introduced (~1e-3 rel).
    """
    if use_bf16_mxu is None:
        use_bf16_mxu = (x.dtype == jnp.bfloat16)
    mxu_dtype = jnp.bfloat16 if use_bf16_mxu else jnp.float32
    # NOTE: deeper levels have 4x less data per plane, so _choose_block's byte
    # target naturally grows B there (fewer, fatter grid steps).
    yh = []
    ll = x
    for _ in range(J):
        ll, high = _dwt_level(ll, mxu_dtype)
        yh.append(high)
    return ll, yh


# ---------------------------------------------------------------------------
# Pure-JAX reference (Haar, zero mode, even H/W) for correctness check.
# ---------------------------------------------------------------------------
def _reference_haar(x):
    a = x[..., 0::2, 0::2]
    b = x[..., 0::2, 1::2]
    c = x[..., 1::2, 0::2]
    d = x[..., 1::2, 1::2]
    ll = (a + b + c + d) * 0.5
    lh = (a + b - c - d) * 0.5   # colhi(rowlo)
    hl = (a - b + c - d) * 0.5   # collo(rowhi)
    hh = (a - b - c + d) * 0.5   # colhi(rowhi)
    return ll, jnp.stack([lh, hl, hh], axis=2)


if __name__ == "__main__":
    key = jax.random.PRNGKey(0)
    k1, k2 = jax.random.split(key)

    # --- J = 1, small image --------------------------------------------------
    x = jax.random.normal(k1, (2, 4, 16, 16), dtype=jnp.float32)
    ll, yh_list = dwt_forward(x, J=1)
    ll = jax.block_until_ready(ll)
    yh = jax.block_until_ready(yh_list[0])

    ll_ref, yh_ref = _reference_haar(x)
    assert ll.shape == (2, 4, 8, 8) and yh.shape == (2, 4, 3, 8, 8)
    np.testing.assert_allclose(np.asarray(ll), np.asarray(ll_ref), atol=1e-5, rtol=1e-5)
    np.testing.assert_allclose(np.asarray(yh), np.asarray(yh_ref), atol=1e-5, rtol=1e-5)

    # --- J = 2, exercises the multi-level path -------------------------------
    x2 = jax.random.normal(k2, (2, 4, 32, 32), dtype=jnp.float32)
    ll2, yh2_list = dwt_forward(x2, J=2)
    ll2 = jax.block_until_ready(ll2)
    r1_ll, r1_hi = _reference_haar(x2)
    r2_ll, r2_hi = _reference_haar(r1_ll)
    assert ll2.shape == (2, 4, 8, 8)
    assert yh2_list[0].shape == (2, 4, 3, 16, 16) and yh2_list[1].shape == (2, 4, 3, 8, 8)
    np.testing.assert_allclose(np.asarray(yh2_list[0]), np.asarray(r1_hi), atol=1e-5, rtol=1e-5)
    np.testing.assert_allclose(np.asarray(yh2_list[1]), np.asarray(r2_hi), atol=1e-5, rtol=1e-5)
    np.testing.assert_allclose(np.asarray(ll2), np.asarray(r2_ll), atol=1e-5, rtol=1e-5)

    print("KERNEL_OK")
</pallas_src>

<mosaic_0001>
module attributes {stable_mosaic.version = 11 : i64} {
  func.func @_dwt_kernel(%arg0: i32, %arg1: memref<64x16xf32, #tpu.memory_space<vmem>>, %arg2: memref<16x16xf32, #tpu.memory_space<vmem>>, %arg3: memref<32x8xf32, #tpu.memory_space<vmem>>, %arg4: memref<4x3x8x8xf32, #tpu.memory_space<vmem>>) attributes {dimension_semantics = [#tpu.dimension_semantics<parallel>], iteration_bounds = array<i64: 2>, scalar_prefetch = 0 : i64, scratch_operands = 0 : i64, tpu.core_type = #tpu.core_type<tc>, window_params = [{transform_indices = @transform_0, window_bounds = array<i64: 64, 16>}, {pipeline_mode = #tpu.pipeline_mode<synchronous>, transform_indices = @transform_1, window_bounds = array<i64: 16, 16>}, {transform_indices = @transform_2, window_bounds = array<i64: 32, 8>}, {transform_indices = @transform_3, window_bounds = array<i64: 4, 3, 8, 8>}]} {
    %c0 = arith.constant 0 : index
    %c0_0 = arith.constant 0 : index
    %0 = vector.load %arg2[%c0, %c0_0] : memref<16x16xf32, #tpu.memory_space<vmem>>, vector<16x16xf32>
    %c0_1 = arith.constant 0 : index
    %c0_2 = arith.constant 0 : index
    %1 = tpu.strided_load %arg1[%c0_1, %c0_2] {strides = array<i32: 2, 1>} : memref<64x16xf32, #tpu.memory_space<vmem>>, vector<32x16xf32>
    %c1 = arith.constant 1 : index
    %c0_3 = arith.constant 0 : index
    %2 = tpu.strided_load %arg1[%c1, %c0_3] {strides = array<i32: 2, 1>} : memref<64x16xf32, #tpu.memory_space<vmem>>, vector<32x16xf32>
    %cst = arith.constant dense<0.000000e+00> : vector<32x16xf32>
    %3 = tpu.matmul %1, %0, %cst {dimension_numbers = #tpu.dot_dimension_numbers<[1], [0], [0], [1], [0, 0, 1, 1], [], []>} : vector<32x16xf32>, vector<16x16xf32>, vector<32x16xf32> -> vector<32x16xf32>
    %cst_4 = arith.constant dense<0.000000e+00> : vector<32x16xf32>
    %4 = tpu.matmul %2, %0, %cst_4 {dimension_numbers = #tpu.dot_dimension_numbers<[1], [0], [0], [1], [0, 0, 1, 1], [], []>} : vector<32x16xf32>, vector<16x16xf32>, vector<32x16xf32> -> vector<32x16xf32>
    %5 = vector.extract_strided_slice %3 {offsets = [0, 0], sizes = [32, 8], strides = [1, 1]} : vector<32x16xf32> to vector<32x8xf32>
    %6 = vector.extract_strided_slice %3 {offsets = [0, 8], sizes = [32, 8], strides = [1, 1]} : vector<32x16xf32> to vector<32x8xf32>
    %7 = vector.extract_strided_slice %4 {offsets = [0, 0], sizes = [32, 8], strides = [1, 1]} : vector<32x16xf32> to vector<32x8xf32>
    %8 = vector.extract_strided_slice %4 {offsets = [0, 8], sizes = [32, 8], strides = [1, 1]} : vector<32x16xf32> to vector<32x8xf32>
    %9 = arith.addf %5, %7 : vector<32x8xf32>
    %c0_5 = arith.constant 0 : index
    %c0_6 = arith.constant 0 : index
    %10 = vector.load %arg3[%c0_5, %c0_6] : memref<32x8xf32, #tpu.memory_space<vmem>>, vector<32x8xf32>
    tpu.vector_store %arg3[%c0_5, %c0_6], %9 {strides = array<i32>} : memref<32x8xf32, #tpu.memory_space<vmem>>, vector<32x8xf32>,
    %11 = arith.subf %5, %7 : vector<32x8xf32>
    %12 = vector.shape_cast %11 : vector<32x8xf32> to vector<4x8x8xf32>
    %c0_7 = arith.constant 0 : index
    %c0_8 = arith.constant 0 : index
    %c0_9 = arith.constant 0 : index
    %c0_10 = arith.constant 0 : index
    %13 = vector.load %arg4[%c0_7, %c0_8, %c0_9, %c0_10] : memref<4x3x8x8xf32, #tpu.memory_space<vmem>>, vector<4x1x8x8xf32>
    %14 = vector.shape_cast %13 : vector<4x1x8x8xf32> to vector<4x8x8xf32>
    %15 = vector.shape_cast %12 : vector<4x8x8xf32> to vector<4x1x8x8xf32>
    tpu.vector_store %arg4[%c0_7, %c0_8, %c0_9, %c0_10], %15 {strides = array<i32>} : memref<4x3x8x8xf32, #tpu.memory_space<vmem>>, vector<4x1x8x8xf32>,
    %16 = arith.addf %6, %8 : vector<32x8xf32>
    %17 = vector.shape_cast %16 : vector<32x8xf32> to vector<4x8x8xf32>
    %c0_11 = arith.constant 0 : index
    %c1_12 = arith.constant 1 : index
    %c0_13 = arith.constant 0 : index
    %c0_14 = arith.constant 0 : index
    %18 = vector.load %arg4[%c0_11, %c1_12, %c0_13, %c0_14] : memref<4x3x8x8xf32, #tpu.memory_space<vmem>>, vector<4x1x8x8xf32>
    %19 = vector.shape_cast %18 : vector<4x1x8x8xf32> to vector<4x8x8xf32>
    %20 = vector.shape_cast %17 : vector<4x8x8xf32> to vector<4x1x8x8xf32>
    tpu.vector_store %arg4[%c0_11, %c1_12, %c0_13, %c0_14], %20 {strides = array<i32>} : memref<4x3x8x8xf32, #tpu.memory_space<vmem>>, vector<4x1x8x8xf32>,
    %21 = arith.subf %6, %8 : vector<32x8xf32>
    %22 = vector.shape_cast %21 : vector<32x8xf32> to vector<4x8x8xf32>
    %c0_15 = arith.constant 0 : index
    %c2 = arith.constant 2 : index
    %c0_16 = arith.constant 0 : index
    %c0_17 = arith.constant 0 : index
    %23 = vector.load %arg4[%c0_15, %c2, %c0_16, %c0_17] : memref<4x3x8x8xf32, #tpu.memory_space<vmem>>, vector<4x1x8x8xf32>
    %24 = vector.shape_cast %23 : vector<4x1x8x8xf32> to vector<4x8x8xf32>
    %25 = vector.shape_cast %22 : vector<4x8x8xf32> to vector<4x1x8x8xf32>
    tpu.vector_store %arg4[%c0_15, %c2, %c0_16, %c0_17], %25 {strides = array<i32>} : memref<4x3x8x8xf32, #tpu.memory_space<vmem>>, vector<4x1x8x8xf32>,
    return
  }
  func.func @transform_0(%arg0: i32) -> (i32, i32) {
    %c0_i32 = arith.constant 0 : i32
    %c0_i32_0 = arith.constant 0 : i32
    return %arg0, %c0_i32 : i32, i32
  }
  func.func @transform_1(%arg0: i32) -> (i32, i32) {
    %c0_i32 = arith.constant 0 : i32
    %c0_i32_0 = arith.constant 0 : i32
    %c0_i32_1 = arith.constant 0 : i32
    return %c0_i32, %c0_i32_0 : i32, i32
  }
  func.func @transform_2(%arg0: i32) -> (i32, i32) {
    %c0_i32 = arith.constant 0 : i32
    %c0_i32_0 = arith.constant 0 : i32
    return %arg0, %c0_i32 : i32, i32
  }
  func.func @transform_3(%arg0: i32) -> (i32, i32, i32, i32) {
    %c0_i32 = arith.constant 0 : i32
    %c0_i32_0 = arith.constant 0 : i32
    %c0_i32_1 = arith.constant 0 : i32
    %c0_i32_2 = arith.constant 0 : i32
    return %arg0, %c0_i32, %c0_i32_0, %c0_i32_1 : i32, i32, i32, i32
  }
}

</mosaic_0001>

<bundles_post_ra>
// kernel: tpu_custom_call.1
= control target key start
LH: loop header
LB: loop body
LE: loop exit
PB: predicated region body
PF: predicated region fallthrough
CT: control target
= control target key end

     0   :  { %9 = vsyncpa [#allocation3], 0  ;;  %s931_s0 = inlined_call_operand.vmem [shape: f32[128,16], index: 0, kind: input, shape index: {}]   ;;  %s932_s1 = inlined_call_operand.vmem [shape: f32[16,16], index: 1, kind: input, shape index: {}]   ;;  %s933_s2 = inlined_call_operand.vmem [shape: f32[64,8], index: 2, kind: output, shape index: {0}]   ;;  %s934_s3 = inlined_call_operand.hbm [shape: f32[8,3,8,8], index: 3, kind: output, shape index: {1}]  }
   0x1   :  { %11 = vsyncpa [#allocation3 + $0x1], 0  ;;  %s776_s12 = smov 0   ;;  %s778_s13 = smov 0  }
   0x2   :  { %s780_s14 = smov 0   ;;  %s782_s15 = smov 0  }
   0x3 LB: > { %s797_s16 = sadd.s32 4294967295, %s750_s15   ;;  %s568_s17 = sadd.s32 4294967294, %s750_s15   ;;  %s750_s15 = sphi %s782_s15, %s940_s15   ;;  %s746_s14 = sphi %s780_s14, %s939_s14   ;;  %s742_s13 = sphi %s778_s13, %s938_s13   ;;  %s738_s12 = sphi %s776_s12, %s937_s12  }
   0x4   : > { %s801_s18 = sadd.s32 1, %s750_s15   ;;  %s97_s19 = sadd.s32 1, %s746_s14 }
   0x5   : > { %s94_s20 = ssub.s32 %s750_s15, %s801_s18  ;;  %p107_p0 = scmp.ne.s32.totalorder %s746_s14, %s742_s13 }
   0x6   : > { %p95_p1 = scmp.eq.s32.totalorder %s94_s20, 0  ;;  %p108_p2 = scmp.eq.s32.totalorder %s797_s16, 1 }
   0x7   : > { %p113_p3 = scmp.ne.s32.totalorder %s742_s13, %s738_s12  ;;  %p114_p4 = scmp.eq.s32.totalorder %s568_s17, 1 }
   0x8   : > { %s812_s21 = scalar_select %p95_p1, %s746_s14, %s97_s19  }
   0x9   : > { %p814_p5 = por %p108_p2, %p107_p0  ;;  %p818_p6 = por %p114_p4, %p113_p3 }
   0xa   : > { %p571_p7 = scmp.ge.s32.totalorder %s750_s15, 1  ;;  %p144_p8 = scmp.lt.s32.totalorder %s750_s15, 3 }
   0xc   : > { %p145_p9 = pnand %p571_p7, %p144_p8 }
   0xd   : > { %v186_v0 = vld [vmem:[%s932_s1] sm:$0xff] (!%p145_p9)  ;;  %v187_v1 = vld [vmem:[%s932_s1 + $0x8] sm:$0xff] (!%p145_p9)  ;;  %s572_s28 = sshll.u32 (!%p145_p9), %s797_s16, 3  ;;  %vm203_vm0 = vcmask (!%p145_p9), 130048   ;;  %s574_s6 = sshll.u32 (!%p145_p9), %s797_s16, 2  ;;  %vm402_vm1 = vcmask (!%p145_p9), 64512  }
   0xe   : > { %148 = sbr.rel (%p145_p9) target bundleno = 382 (0x17e), region = 28  ;;  %v636_v2 = vpack.c.bf16 (!%p145_p9), %v187_v1, %v186_v0  ;;  %p174_p10 = scmp.lt.s32.totalorder (!%p145_p9), %s572_s28, 15 }
   0xf   : > { %p180_p11 = scmp.lt.s32.totalorder (!%p145_p9), %s574_s6, 7  ;;  %s170_s7 = sand.u32 (!%p145_p9), 1, %s742_s13  }
  0x10   : > { %637 = vmatprep.subr.bf16.mxu0 (!%p145_p9), %v636_v2  ;;  %641 = vmatprep.subr.bf16.mxu1 (!%p145_p9), %v636_v2  ;;  %s644_s8 = smul.u32 (!%p145_p9), 96, %s170_s7  ;;  %s752_s19 = smov (!%p145_p9), 120  }
  0x11   : > { %639 = vmatpush3.bf16.msra.mxu0 (!%p145_p9), %v636_v2  ;;  %643 = vmatpush3.bf16.msra.mxu1 (!%p145_p9), %v636_v2  ;;  %s645_s24 = smul.u32 (!%p145_p9), 1536, %s797_s16  ;;  %s890_s16 = scalar_lea.sflag (!%p145_p9), [#allocation3], %s170_s7 }
  0x12   : > { %s849_s20 = scalar_lea.vmem (!%p145_p9), [#allocation2], %s644_s8  ;;  %s753_s30 = smov (!%p145_p9), [#allocation2]  }
  0x13   : > { %s481_s25 = sshll.u32 (!%p145_p9), %s849_s20, 4  ;;  %s692_s4 = sshll.u32 (!%p145_p9), %s753_s30, 4  ;;  %s882_s25 = int_to_ptr.vmem [resolvable:$true] %s481_s25  ;;  %s693_s4 = int_to_ptr.vmem [resolvable:$false] %s692_s4 }
  0x14   : > { %p695_p1 = scmp.lt.s32.totalorder (!%p145_p9), %s882_s25, %s693_s4 }
  0x15   : > { %s942_s28 = smov (!%p174_p10, %s572_s28), 15  ;;  %s944_s6 = smov (!%p180_p11, %s574_s6), 7 }
  0x16   : > { %s573_s29 = sshll.u32 %s942_s28, 3  ;;  %s575_s9 = sshll.u32 %s944_s6, 3 }
  0x17   : > { %s177_s5 = scalar_lea.vmem %s931_s0, %s573_s29  ;;  %s183_s17 = scalar_lea.vmem %s933_s2, %s575_s9 }
  0x18   : > { %v188_v3 = vld [vmem:[%s177_s5] ss:$2 sm:$0xff]  ;;  %v579_v4 = vld [vmem:[%s177_s5 + $0x1] ss:$2 sm:$0xff]  ;;  %v576_v5 = vld [vmem:[%s177_s5 + $0x10] ss:$2 sm:$0xff]  ;;  %s880_s28 = scalar_lea.hbm %s934_s3, %s645_s24 }
  0x19   : > { %620 = vmatprep.mubr.msk.f32.mxu0 %vm203_vm0, %v188_v3  ;;  %630 = vmatprep.mubr.msk.f32.mxu1 %vm203_vm0, %v579_v4  ;;  %v580_v6 = vld [vmem:[%s177_s5 + $0x11] ss:$2 sm:$0xff]  ;;  %v577_v7 = vld [vmem:[%s177_s5 + $0x20] ss:$2 sm:$0xff]  ;;  %v581_v8 = vld [vmem:[%s177_s5 + $0x21] ss:$2 sm:$0xff] }
  0x1a   : > { %621 = vmatmul.mubr.msk.f32.vlgmr.msra.gmra.mrb[0].mxu0 %vm203_vm0, %v576_v5  ;;  %631 = vmatmul.mubr.msk.f32.vlgmr.msra.gmra.mrb[0].mxu1 %vm203_vm0, %v580_v6  ;;  %v578_v9 = vld [vmem:[%s177_s5 + $0x30] ss:$2 sm:$0xff]  ;;  %v582_v10 = vld [vmem:[%s177_s5 + $0x31] ss:$2 sm:$0xff]  ;;  %s688_s29 = scalar_lea.vmem %s882_s25, 1536  ;;  %s694_s5 = scalar_lea.vmem %s693_s4, 3072 }
  0x1b   : > { %623 = vmatprep.mubr.msk.f32.mxu0 %vm203_vm0, %v577_v7  ;;  %633 = vmatprep.mubr.msk.f32.mxu1 %vm203_vm0, %v581_v8  ;;  %p689_p12 = scmp.ne.s32.totalorder %s882_s25, %s688_s29  ;;  %p696_p2 = scmp.lt.s32.totalorder %s694_s5, %s688_s29 }
  0x1d   : > { %p690_p13 = pnand %p689_p12, %p814_p5  ;;  %p697_p3 = por %p696_p2, %p695_p1 }
  0x1e   : > { %624 = vmatmul.mubr.msk.f32.gmra.mrb[2].mxu0 %vm203_vm0, %v578_v9  ;;  %634 = vmatmul.mubr.msk.f32.gmra.mrb[2].mxu1 %vm203_vm0, %v582_v10 }
  0x1f   : > { %p691_p0 = pneg %p690_p13 }
  0x21   : > { %p698_p4 = pnand %p697_p3, %p691_p0 }
  0xed   : > { %v622_v11 = vpop.f32.mrb[0].mxu0  ;;  %v632_v12 = vpop.f32.mrb[0].mxu1 }
  0xee   : > { %v282_v13 = vpop.f32.mrb[1].mxu0  ;;  %v379_v14 = vpop.f32.mrb[1].mxu1  ;;  %v408_v15 = vsub.f32 %v622_v11, %v632_v12  ;;  %v399_v16 = vadd.f32 %v632_v12, %v622_v11 }
  0xef   : > { %v398_v17 = vadd.f32 %v379_v14, %v282_v13  ;;  %v407_v18 = vsub.f32 %v282_v13, %v379_v14 }
  0xf0   : > { %442 = vrot.lane.b32.xlu1 %v408_v15, %s752_s19  ;;  %412 = vst.msk [vmem:[%s849_s20 + $0x18] sm:$0xff] %vm402_vm1, %v408_v15  ;;  %421 = vrot.lane.b32.xlu0 %v399_v16, %s752_s19  ;;  %404 = vst.msk [vmem:[%s183_s17 + $0x8] sm:$0xff] %vm402_vm1, %v399_v16 }
  0xf1   : > { %403 = vst.msk [vmem:[%s183_s17] sm:$0xff] %vm402_vm1, %v398_v17  ;;  %411 = vst.msk [vmem:[%s849_s20] sm:$0xff] %vm402_vm1, %v407_v18  ;;  %v625_v19 = vpop.f32.mrb[2].mxu0  ;;  %v635_v20 = vpop.f32.mrb[2].mxu1 }
  0xf2   : > { %v401_v21 = vadd.f32 %v635_v20, %v625_v19  ;;  %v410_v22 = vsub.f32 %v625_v19, %v635_v20  ;;  %v292_v23 = vpop.f32.mrb[3].mxu0  ;;  %v389_v24 = vpop.f32.mrb[3].mxu1 }
  0xf3   : > { %v400_v25 = vadd.f32 %v389_v24, %v292_v23  ;;  %v409_v26 = vsub.f32 %v292_v23, %v389_v24 }
  0xf4   : > { %414 = vst.msk [vmem:[%s849_s20 + $0x48] sm:$0xff] %vm402_vm1, %v410_v22  ;;  %419 = vrot.lane.b32.xlu0 %v398_v17, %s752_s19  ;;  %425 = vrot.lane.b32.xlu1 %v401_v21, %s752_s19  ;;  %406 = vst.msk [vmem:[%s183_s17 + $0x18] sm:$0xff] %vm402_vm1, %v401_v21 }
  0xf5   : > { %405 = vst.msk [vmem:[%s183_s17 + $0x10] sm:$0xff] %vm402_vm1, %v400_v25  ;;  %413 = vst.msk [vmem:[%s849_s20 + $0x30] sm:$0xff] %vm402_vm1, %v409_v26 }
  0xf8   : > { %440 = vrot.lane.b32.xlu0 %v407_v18, %s752_s19  ;;  %423 = vrot.lane.b32.xlu1 %v400_v25, %s752_s19 }
  0xfc   : > { %444 = vrot.lane.b32.xlu0 %v409_v26, %s752_s19  ;;  %446 = vrot.lane.b32.xlu1 %v410_v22, %s752_s19 }
 0x162   : > { %v443_v27 = vpop.permute.xlu1 %442  ;;  %v422_v28 = vpop.permute.xlu0 %421 }
 0x163   : > { %596 = vst.msk [vmem:[%s849_s20 + $0x28] sm:$0xff] %vm402_vm1, %v443_v27  ;;  %592 = vst.msk [vmem:[%s849_s20 + $0x20] sm:$0xff] %vm402_vm1, %v422_v28 }
 0x166   : > { %v420_v29 = vpop.permute.xlu0 %419  ;;  %v426_v30 = vpop.permute.xlu1 %425 }
 0x167   : > { %591 = vst.msk [vmem:[%s849_s20 + $0x8] sm:$0xff] %vm402_vm1, %v420_v29  ;;  %594 = vst.msk [vmem:[%s849_s20 + $0x50] sm:$0xff] %vm402_vm1, %v426_v30 }
 0x16a   : > { %v441_v31 = vpop.permute.xlu0 %440  ;;  %v424_v32 = vpop.permute.xlu1 %423 }
 0x16b   : > { %595 = vst.msk [vmem:[%s849_s20 + $0x10] sm:$0xff] %vm402_vm1, %v441_v31  ;;  %593 = vst.msk [vmem:[%s849_s20 + $0x38] sm:$0xff] %vm402_vm1, %v424_v32 }
 0x16e   : > { %v445_v33 = vpop.permute.xlu0 %444  ;;  %v447_v34 = vpop.permute.xlu1 %446 }
 0x16f   : > { %597 = vst.msk [vmem:[%s849_s20 + $0x40] sm:$0xff] %vm402_vm1, %v445_v33  ;;  %598 = vst.msk [vmem:[%s849_s20 + $0x58] sm:$0xff] %vm402_vm1, %v447_v34 }
 0x170   : > { %701 = shalt.err (!%p698_p4)
}
 0x171   : > { %s702_s6 = scalar_lea.hbm %s880_s28, 1536  ;;  %s706_s9 = scalar_lea.hbm %s934_s3, 3072 }
 0x172   : > { %p703_p7 = scmp.ne.s32.totalorder %s880_s28, %s702_s6  ;;  %p707_p10 = scmp.lt.u32.totalorder %s880_s28, %s934_s3 }
 0x173   : > { %p708_p11 = scmp.lt.u32.totalorder %s706_s9, %s702_s6  ;;  %p710_p13 = scmp.lt.u32.totalorder %s702_s6, %s880_s28 }
 0x174   : > { %p704_p8 = pnand %p703_p7, %p814_p5 }
 0x175   : > { %p709_p12 = por %p708_p11, %p707_p10 }
 0x176   : > { %p705_p9 = pneg %p704_p8 }
 0x177   : > { %p711_p0 = por %p710_p13, %p709_p12 }
 0x179   : > { %p712_p1 = pnand %p711_p0, %p705_p9 }
 0x17b   : > { %715 = shalt.err (!%p712_p1)
}
 0x17c   : > { %s754_s17 = smov 128   ;;  %s755_s19 = smov 8  }
 0x17d   : > { %646 = dma.vmem_to_hbm [thread:$0]  (%p814_p5), %s882_s25, 1536, %s880_s28, %s890_s16, %s754_s17, %s754_s17, %s755_s19  }
 0x17e PF: > { %p652_p2 = scmp.ge.s32.totalorder %s750_s15, 2  ;;  %s504_s20 = sand.u32 1, %s738_s12  }
 0x17f   : > { %s505_s24 = scalar_lea.sflag [#allocation3], %s504_s20 }
 0x180   : > { %p649_p3 = pnand %p652_p2, %p818_p6 }
 0x182   : > { %733 = dma.done.wait (!%p649_p3), %s505_s24, 1536  }
 0x183   : > { %735 = vsyncadd (!%p649_p3), %s505_s24, 4294965760  ;;  %p14_p4 = scmp.ge.s32.totalorder %s801_s18, 4   ;;  %s937_s12 = smov %s742_s13 }
 0x184   : > { %s938_s13 = smov %s746_s14  ;;  %s939_s14 = smov %s812_s21 }
 0x185   : > { %s940_s15 = smov %s801_s18  ;;  %16 = sbr.rel (!%p14_p4) target bundleno = 3 (0x3), region = 84 }
 0x18c   :  { %510 = vsyncpa [#allocation3], 1 }
 0x18d   :  { %512 = vsyncpa [#allocation3 + $0x1], 1 }

</bundles_post_ra>
